<compile_context>
chip_gen: v6e
topology: v6e:2x2x1
jax: 0.10.0
libtpu: 0.0.40
codegen_flags: <defaults>
</compile_context>

<pallas_src>
import functools

import jax
import jax.numpy as jnp
from jax import lax
from jax.experimental import pallas as pl
from jax.experimental.pallas import tpu as pltpu


def _dsconv_kernel(x_ref, dwc_ref, pw_ref, b_ref, o_ref, *,
                   K, Cin, Cout, N, Wp, S_pad):
    """One grid step = whole batch, all channels.

    x_ref   : (Cin*N, S_pad)   padded images, flattened spatial on lanes   [VMEM]
    dwc_ref : (Cin*N, K*K)     depthwise weights, row ci*N+n = dw[ci, :]   [VMEM]
    pw_ref  : (Cout*Cin,)      pointwise weights, flat [co*Cin + ci]       [SMEM]
    b_ref   : (Cout,)          pointwise bias                              [SMEM]
    o_ref   : (Cout, N, S_pad) stride-1 result, flattened spatial on lanes [VMEM]
    """
    x = x_ref[...].astype(jnp.float32)                       # (Cin*N, S_pad)

    # ---- depthwise KxK conv: one lane roll + one broadcast MAC per tap --------
    # Shifting by kh*Wp + kw in the flattened layout == shifting by (kh, kw) in
    # 2-D for every valid output position; wrap-around garbage lands only at flat
    # positions >= the valid range and is cropped by the wrapper.
    acc = x * dwc_ref[:, 0:1]                                 # tap (0, 0), no shift
    for t in range(1, K * K):
        kh, kw = divmod(t, K)
        off = kh * Wp + kw
        shifted = pltpu.roll(x, shift=S_pad - off, axis=1)    # out[i] = x[i + off]
        acc = acc + shifted * dwc_ref[:, t:t + 1]

    # Per-input-channel (N, S_pad) slabs (static sublane slices; small enough to
    # stay in vregs here -- stage in a VMEM scratch if the spatial tile grows).
    dw = [acc[ci * N:(ci + 1) * N, :] for ci in range(Cin)]

    # ---- pointwise 1x1 conv + bias: VPU scalar MACs, direct per-channel store --
    for co in range(Cout):
        r = dw[0] * pw_ref[co * Cin] + b_ref[co]
        for ci in range(1, Cin):
            r = r + dw[ci] * pw_ref[co * Cin + ci]
        o_ref[co] = r.astype(o_ref.dtype)                     # no stack / reshape


def depthwise_separable_conv(x_nchw, dw_weight, pw_weight, pw_bias, *,
                             stride=1, padding=0):
    """Forward pass matching the PyTorch DepthwiseSeparableConv module.

    x_nchw    : (N, Cin, H, W)
    dw_weight : (Cin, 1, K, K)      depthwise Conv2d weight (groups=Cin, no bias)
    pw_weight : (Cout, Cin, 1, 1)   pointwise Conv2d weight
    pw_bias   : (Cout,)             pointwise Conv2d bias
    returns   : (N, Cout, H_out, W_out)
    """
    N, Cin, H, W = x_nchw.shape
    K = dw_weight.shape[-1]
    Cout = pw_weight.shape[0]
    Hp, Wp = H + 2 * padding, W + 2 * padding
    Hf, Wf = Hp - K + 1, Wp - K + 1                 # stride-1 valid extents
    S = Hp * Wp
    S_pad = ((S + 127) // 128) * 128                # lane-align flattened spatial axis

    # ---- wrapper-side layout glue (HBM, outside the kernel) -------------------
    x_pad = jnp.pad(x_nchw,
                    ((0, 0), (0, 0), (padding, padding), (padding, padding)))
    # (N, Cin, Hp, Wp) -> (Cin, N, Hp*Wp) -> pad lanes -> (Cin*N, S_pad)
    x_cn = jnp.transpose(x_pad, (1, 0, 2, 3)).reshape(Cin * N, S)
    x_cn = jnp.pad(x_cn, ((0, 0), (0, S_pad - S)))

    # Depthwise weights: row ci*N+n carries dw[ci], so a single (Cin*N, 1) column
    # per tap broadcast-multiplies the whole fused slab.
    dw_cols = jnp.repeat(
        dw_weight[:, 0].reshape(Cin, K * K).astype(jnp.float32), N, axis=0)
    pw_flat = pw_weight[:, :, 0, 0].reshape(Cout * Cin).astype(jnp.float32)
    bias = pw_bias.reshape(Cout).astype(jnp.float32)

    kernel = functools.partial(_dsconv_kernel, K=K, Cin=Cin, Cout=Cout, N=N,
                               Wp=Wp, S_pad=S_pad)

    out_flat = pl.pallas_call(
        kernel,
        out_shape=jax.ShapeDtypeStruct((Cout, N, S_pad), x_nchw.dtype),
        grid_spec=pltpu.PrefetchScalarGridSpec(
            num_scalar_prefetch=0,
            grid=(1,),                              # whole (toy) problem in one step
            in_specs=[
                pl.BlockSpec((Cin * N, S_pad), lambda i: (0, 0)),
                pl.BlockSpec((Cin * N, K * K), lambda i: (0, 0)),
                pl.BlockSpec(memory_space=pltpu.MemorySpace.SMEM),   # pointwise w
                pl.BlockSpec(memory_space=pltpu.MemorySpace.SMEM),   # bias
            ],
            out_specs=pl.BlockSpec((Cout, N, S_pad), lambda i: (0, 0, 0)),
        ),
        compiler_params=pltpu.CompilerParams(
            # Single step here; at real sizes add an H-tile axis of extent >= 2
            # marked "parallel" so v7x's two TensorCores shard it.
            dimension_semantics=("arbitrary",),
            vmem_limit_bytes=32 * 1024 * 1024,
        ),
    )(x_cn, dw_cols, pw_flat, bias)

    # ---- crop / un-flatten / stride subsample / NCHW: cheap HBM-side ops ------
    out = out_flat[:, :, :S].reshape(Cout, N, Hp, Wp)
    out = out[:, :, :Hf:stride, :Wf:stride]         # stride handled outside kernel
    return jnp.transpose(out, (1, 0, 2, 3))         # (N, Cout, H_out, W_out)


def _reference(x_nchw, dw_weight, pw_weight, pw_bias, *, stride, padding):
    """Pure-JAX reference (lax convs) for correctness checking."""
    Cin = x_nchw.shape[1]
    dn = lax.conv_dimension_numbers(x_nchw.shape, dw_weight.shape,
                                    ("NCHW", "OIHW", "NCHW"))
    y = lax.conv_general_dilated(
        x_nchw, dw_weight, window_strides=(stride, stride),
        padding=((padding, padding), (padding, padding)),
        dimension_numbers=dn, feature_group_count=Cin)
    dn2 = lax.conv_dimension_numbers(y.shape, pw_weight.shape,
                                     ("NCHW", "OIHW", "NCHW"))
    z = lax.conv_general_dilated(
        y, pw_weight, window_strides=(1, 1), padding="VALID",
        dimension_numbers=dn2)
    return z + pw_bias.reshape(1, -1, 1, 1)


if __name__ == "__main__":
    # Module config (small, consistent with the PyTorch __init__):
    N, Cin, H, W = 2, 4, 16, 16
    Cout, K, stride, padding = 8, 3, 1, 1
    H_out = (H + 2 * padding - K) // stride + 1
    W_out = (W + 2 * padding - K) // stride + 1

    key = jax.random.PRNGKey(0)
    k_x, k_dw, k_pw, k_b = jax.random.split(key, 4)

    x = jax.random.normal(k_x, (N, Cin, H, W), dtype=jnp.float32)
    # PyTorch parameter shapes:
    dw_weight = jax.random.normal(k_dw, (Cin, 1, K, K), dtype=jnp.float32) * 0.1
    pw_weight = jax.random.normal(k_pw, (Cout, Cin, 1, 1), dtype=jnp.float32) * 0.1
    pw_bias = jax.random.normal(k_b, (Cout,), dtype=jnp.float32) * 0.1

    out = depthwise_separable_conv(x, dw_weight, pw_weight, pw_bias,
                                   stride=stride, padding=padding)
    out = jax.block_until_ready(out)

    ref = _reference(x, dw_weight, pw_weight, pw_bias,
                     stride=stride, padding=padding)
    assert out.shape == (N, Cout, H_out, W_out), out.shape
    assert jnp.allclose(out, ref, atol=1e-4, rtol=1e-4), "mismatch vs reference"

    print("KERNEL_OK")
</pallas_src>

<mosaic_0001>
module attributes {stable_mosaic.version = 11 : i64} {
  func.func @_dsconv_kernel(%arg0: i32, %arg1: memref<8x384xf32, #tpu.memory_space<vmem>>, %arg2: memref<8x9xf32, #tpu.memory_space<vmem>>, %arg3: memref<32xf32, #tpu.memory_space<smem>>, %arg4: memref<8xf32, #tpu.memory_space<smem>>, %arg5: memref<8x2x384xf32, #tpu.memory_space<vmem>>) attributes {dimension_semantics = [#tpu.dimension_semantics<arbitrary>], iteration_bounds = array<i64: 1>, scalar_prefetch = 0 : i64, scratch_operands = 0 : i64, tpu.core_type = #tpu.core_type<tc>, window_params = [{pipeline_mode = #tpu.pipeline_mode<synchronous>, transform_indices = @transform_0, window_bounds = array<i64: 8, 384>}, {pipeline_mode = #tpu.pipeline_mode<synchronous>, transform_indices = @transform_1, window_bounds = array<i64: 8, 9>}, {transform_indices = @transform_2, window_bounds = array<i64: 32>}, {transform_indices = @transform_3, window_bounds = array<i64: 8>}, {pipeline_mode = #tpu.pipeline_mode<synchronous>, transform_indices = @transform_4, window_bounds = array<i64: 8, 2, 384>}]} {
    %c0 = arith.constant 0 : index
    %c0_0 = arith.constant 0 : index
    %0 = vector.load %arg1[%c0, %c0_0] : memref<8x384xf32, #tpu.memory_space<vmem>>, vector<8x384xf32>
    %c0_1 = arith.constant 0 : index
    %c0_2 = arith.constant 0 : index
    %1 = vector.load %arg2[%c0_1, %c0_2] : memref<8x9xf32, #tpu.memory_space<vmem>>, vector<8x1xf32>
    %2 = vector.broadcast %1 : vector<8x1xf32> to vector<8x384xf32>
    %3 = arith.mulf %0, %2 : vector<8x384xf32>
    %c383_i32 = arith.constant 383 : i32
    %4 = tpu.dynamic_rotate %0 by %c383_i32 dim 1 : vector<8x384xf32>, i32 -> vector<8x384xf32>
    %c0_3 = arith.constant 0 : index
    %c1 = arith.constant 1 : index
    %5 = vector.load %arg2[%c0_3, %c1] : memref<8x9xf32, #tpu.memory_space<vmem>>, vector<8x1xf32>
    %6 = vector.broadcast %5 : vector<8x1xf32> to vector<8x384xf32>
    %7 = arith.mulf %4, %6 : vector<8x384xf32>
    %8 = arith.addf %3, %7 : vector<8x384xf32>
    %c382_i32 = arith.constant 382 : i32
    %9 = tpu.dynamic_rotate %0 by %c382_i32 dim 1 : vector<8x384xf32>, i32 -> vector<8x384xf32>
    %c0_4 = arith.constant 0 : index
    %c2 = arith.constant 2 : index
    %10 = vector.load %arg2[%c0_4, %c2] : memref<8x9xf32, #tpu.memory_space<vmem>>, vector<8x1xf32>
    %11 = vector.broadcast %10 : vector<8x1xf32> to vector<8x384xf32>
    %12 = arith.mulf %9, %11 : vector<8x384xf32>
    %13 = arith.addf %8, %12 : vector<8x384xf32>
    %c366_i32 = arith.constant 366 : i32
    %14 = tpu.dynamic_rotate %0 by %c366_i32 dim 1 : vector<8x384xf32>, i32 -> vector<8x384xf32>
    %c0_5 = arith.constant 0 : index
    %c3 = arith.constant 3 : index
    %15 = vector.load %arg2[%c0_5, %c3] : memref<8x9xf32, #tpu.memory_space<vmem>>, vector<8x1xf32>
    %16 = vector.broadcast %15 : vector<8x1xf32> to vector<8x384xf32>
    %17 = arith.mulf %14, %16 : vector<8x384xf32>
    %18 = arith.addf %13, %17 : vector<8x384xf32>
    %c365_i32 = arith.constant 365 : i32
    %19 = tpu.dynamic_rotate %0 by %c365_i32 dim 1 : vector<8x384xf32>, i32 -> vector<8x384xf32>
    %c0_6 = arith.constant 0 : index
    %c4 = arith.constant 4 : index
    %20 = vector.load %arg2[%c0_6, %c4] : memref<8x9xf32, #tpu.memory_space<vmem>>, vector<8x1xf32>
    %21 = vector.broadcast %20 : vector<8x1xf32> to vector<8x384xf32>
    %22 = arith.mulf %19, %21 : vector<8x384xf32>
    %23 = arith.addf %18, %22 : vector<8x384xf32>
    %c364_i32 = arith.constant 364 : i32
    %24 = tpu.dynamic_rotate %0 by %c364_i32 dim 1 : vector<8x384xf32>, i32 -> vector<8x384xf32>
    %c0_7 = arith.constant 0 : index
    %c5 = arith.constant 5 : index
    %25 = vector.load %arg2[%c0_7, %c5] : memref<8x9xf32, #tpu.memory_space<vmem>>, vector<8x1xf32>
    %26 = vector.broadcast %25 : vector<8x1xf32> to vector<8x384xf32>
    %27 = arith.mulf %24, %26 : vector<8x384xf32>
    %28 = arith.addf %23, %27 : vector<8x384xf32>
    %c348_i32 = arith.constant 348 : i32
    %29 = tpu.dynamic_rotate %0 by %c348_i32 dim 1 : vector<8x384xf32>, i32 -> vector<8x384xf32>
    %c0_8 = arith.constant 0 : index
    %c6 = arith.constant 6 : index
    %30 = vector.load %arg2[%c0_8, %c6] : memref<8x9xf32, #tpu.memory_space<vmem>>, vector<8x1xf32>
    %31 = vector.broadcast %30 : vector<8x1xf32> to vector<8x384xf32>
    %32 = arith.mulf %29, %31 : vector<8x384xf32>
    %33 = arith.addf %28, %32 : vector<8x384xf32>
    %c347_i32 = arith.constant 347 : i32
    %34 = tpu.dynamic_rotate %0 by %c347_i32 dim 1 : vector<8x384xf32>, i32 -> vector<8x384xf32>
    %c0_9 = arith.constant 0 : index
    %c7 = arith.constant 7 : index
    %35 = vector.load %arg2[%c0_9, %c7] : memref<8x9xf32, #tpu.memory_space<vmem>>, vector<8x1xf32>
    %36 = vector.broadcast %35 : vector<8x1xf32> to vector<8x384xf32>
    %37 = arith.mulf %34, %36 : vector<8x384xf32>
    %38 = arith.addf %33, %37 : vector<8x384xf32>
    %c346_i32 = arith.constant 346 : i32
    %39 = tpu.dynamic_rotate %0 by %c346_i32 dim 1 : vector<8x384xf32>, i32 -> vector<8x384xf32>
    %c0_10 = arith.constant 0 : index
    %c8 = arith.constant 8 : index
    %40 = vector.load %arg2[%c0_10, %c8] : memref<8x9xf32, #tpu.memory_space<vmem>>, vector<8x1xf32>
    %41 = vector.broadcast %40 : vector<8x1xf32> to vector<8x384xf32>
    %42 = arith.mulf %39, %41 : vector<8x384xf32>
    %43 = arith.addf %38, %42 : vector<8x384xf32>
    %44 = vector.extract_strided_slice %43 {offsets = [0, 0], sizes = [2, 384], strides = [1, 1]} : vector<8x384xf32> to vector<2x384xf32>
    %45 = vector.extract_strided_slice %43 {offsets = [2, 0], sizes = [2, 384], strides = [1, 1]} : vector<8x384xf32> to vector<2x384xf32>
    %46 = vector.extract_strided_slice %43 {offsets = [4, 0], sizes = [2, 384], strides = [1, 1]} : vector<8x384xf32> to vector<2x384xf32>
    %47 = vector.extract_strided_slice %43 {offsets = [6, 0], sizes = [2, 384], strides = [1, 1]} : vector<8x384xf32> to vector<2x384xf32>
    %c0_11 = arith.constant 0 : index
    %48 = memref.load %arg3[%c0_11] : memref<32xf32, #tpu.memory_space<smem>>
    %49 = vector.broadcast %48 : f32 to vector<2x384xf32>
    %50 = arith.mulf %44, %49 : vector<2x384xf32>
    %c0_12 = arith.constant 0 : index
    %51 = memref.load %arg4[%c0_12] : memref<8xf32, #tpu.memory_space<smem>>
    %52 = vector.broadcast %51 : f32 to vector<2x384xf32>
    %53 = arith.addf %50, %52 : vector<2x384xf32>
    %c1_13 = arith.constant 1 : index
    %54 = memref.load %arg3[%c1_13] : memref<32xf32, #tpu.memory_space<smem>>
    %55 = vector.broadcast %54 : f32 to vector<2x384xf32>
    %56 = arith.mulf %45, %55 : vector<2x384xf32>
    %57 = arith.addf %53, %56 : vector<2x384xf32>
    %c2_14 = arith.constant 2 : index
    %58 = memref.load %arg3[%c2_14] : memref<32xf32, #tpu.memory_space<smem>>
    %59 = vector.broadcast %58 : f32 to vector<2x384xf32>
    %60 = arith.mulf %46, %59 : vector<2x384xf32>
    %61 = arith.addf %57, %60 : vector<2x384xf32>
    %c3_15 = arith.constant 3 : index
    %62 = memref.load %arg3[%c3_15] : memref<32xf32, #tpu.memory_space<smem>>
    %63 = vector.broadcast %62 : f32 to vector<2x384xf32>
    %64 = arith.mulf %47, %63 : vector<2x384xf32>
    %65 = arith.addf %61, %64 : vector<2x384xf32>
    %c0_16 = arith.constant 0 : index
    %c0_17 = arith.constant 0 : index
    %c0_18 = arith.constant 0 : index
    %66 = vector.load %arg5[%c0_16, %c0_17, %c0_18] : memref<8x2x384xf32, #tpu.memory_space<vmem>>, vector<1x2x384xf32>
    %67 = vector.shape_cast %66 : vector<1x2x384xf32> to vector<2x384xf32>
    %68 = vector.shape_cast %65 : vector<2x384xf32> to vector<1x2x384xf32>
    tpu.vector_store %arg5[%c0_16, %c0_17, %c0_18], %68 {strides = array<i32>} : memref<8x2x384xf32, #tpu.memory_space<vmem>>, vector<1x2x384xf32>,
    %c4_19 = arith.constant 4 : index
    %69 = memref.load %arg3[%c4_19] : memref<32xf32, #tpu.memory_space<smem>>
    %70 = vector.broadcast %69 : f32 to vector<2x384xf32>
    %71 = arith.mulf %44, %70 : vector<2x384xf32>
    %c1_20 = arith.constant 1 : index
    %72 = memref.load %arg4[%c1_20] : memref<8xf32, #tpu.memory_space<smem>>
    %73 = vector.broadcast %72 : f32 to vector<2x384xf32>
    %74 = arith.addf %71, %73 : vector<2x384xf32>
    %c5_21 = arith.constant 5 : index
    %75 = memref.load %arg3[%c5_21] : memref<32xf32, #tpu.memory_space<smem>>
    %76 = vector.broadcast %75 : f32 to vector<2x384xf32>
    %77 = arith.mulf %45, %76 : vector<2x384xf32>
    %78 = arith.addf %74, %77 : vector<2x384xf32>
    %c6_22 = arith.constant 6 : index
    %79 = memref.load %arg3[%c6_22] : memref<32xf32, #tpu.memory_space<smem>>
    %80 = vector.broadcast %79 : f32 to vector<2x384xf32>
    %81 = arith.mulf %46, %80 : vector<2x384xf32>
    %82 = arith.addf %78, %81 : vector<2x384xf32>
    %c7_23 = arith.constant 7 : index
    %83 = memref.load %arg3[%c7_23] : memref<32xf32, #tpu.memory_space<smem>>
    %84 = vector.broadcast %83 : f32 to vector<2x384xf32>
    %85 = arith.mulf %47, %84 : vector<2x384xf32>
    %86 = arith.addf %82, %85 : vector<2x384xf32>
    %c1_24 = arith.constant 1 : index
    %c0_25 = arith.constant 0 : index
    %c0_26 = arith.constant 0 : index
    %87 = vector.load %arg5[%c1_24, %c0_25, %c0_26] : memref<8x2x384xf32, #tpu.memory_space<vmem>>, vector<1x2x384xf32>
    %88 = vector.shape_cast %87 : vector<1x2x384xf32> to vector<2x384xf32>
    %89 = vector.shape_cast %86 : vector<2x384xf32> to vector<1x2x384xf32>
    tpu.vector_store %arg5[%c1_24, %c0_25, %c0_26], %89 {strides = array<i32>} : memref<8x2x384xf32, #tpu.memory_space<vmem>>, vector<1x2x384xf32>,
    %c8_27 = arith.constant 8 : index
    %90 = memref.load %arg3[%c8_27] : memref<32xf32, #tpu.memory_space<smem>>
    %91 = vector.broadcast %90 : f32 to vector<2x384xf32>
    %92 = arith.mulf %44, %91 : vector<2x384xf32>
    %c2_28 = arith.constant 2 : index
    %93 = memref.load %arg4[%c2_28] : memref<8xf32, #tpu.memory_space<smem>>
    %94 = vector.broadcast %93 : f32 to vector<2x384xf32>
    %95 = arith.addf %92, %94 : vector<2x384xf32>
    %c9 = arith.constant 9 : index
    %96 = memref.load %arg3[%c9] : memref<32xf32, #tpu.memory_space<smem>>
    %97 = vector.broadcast %96 : f32 to vector<2x384xf32>
    %98 = arith.mulf %45, %97 : vector<2x384xf32>
    %99 = arith.addf %95, %98 : vector<2x384xf32>
    %c10 = arith.constant 10 : index
    %100 = memref.load %arg3[%c10] : memref<32xf32, #tpu.memory_space<smem>>
    %101 = vector.broadcast %100 : f32 to vector<2x384xf32>
    %102 = arith.mulf %46, %101 : vector<2x384xf32>
    %103 = arith.addf %99, %102 : vector<2x384xf32>
    %c11 = arith.constant 11 : index
    %104 = memref.load %arg3[%c11] : memref<32xf32, #tpu.memory_space<smem>>
    %105 = vector.broadcast %104 : f32 to vector<2x384xf32>
    %106 = arith.mulf %47, %105 : vector<2x384xf32>
    %107 = arith.addf %103, %106 : vector<2x384xf32>
    %c2_29 = arith.constant 2 : index
    %c0_30 = arith.constant 0 : index
    %c0_31 = arith.constant 0 : index
    %108 = vector.load %arg5[%c2_29, %c0_30, %c0_31] : memref<8x2x384xf32, #tpu.memory_space<vmem>>, vector<1x2x384xf32>
    %109 = vector.shape_cast %108 : vector<1x2x384xf32> to vector<2x384xf32>
    %110 = vector.shape_cast %107 : vector<2x384xf32> to vector<1x2x384xf32>
    tpu.vector_store %arg5[%c2_29, %c0_30, %c0_31], %110 {strides = array<i32>} : memref<8x2x384xf32, #tpu.memory_space<vmem>>, vector<1x2x384xf32>,
    %c12 = arith.constant 12 : index
    %111 = memref.load %arg3[%c12] : memref<32xf32, #tpu.memory_space<smem>>
    %112 = vector.broadcast %111 : f32 to vector<2x384xf32>
    %113 = arith.mulf %44, %112 : vector<2x384xf32>
    %c3_32 = arith.constant 3 : index
    %114 = memref.load %arg4[%c3_32] : memref<8xf32, #tpu.memory_space<smem>>
    %115 = vector.broadcast %114 : f32 to vector<2x384xf32>
    %116 = arith.addf %113, %115 : vector<2x384xf32>
    %c13 = arith.constant 13 : index
    %117 = memref.load %arg3[%c13] : memref<32xf32, #tpu.memory_space<smem>>
    %118 = vector.broadcast %117 : f32 to vector<2x384xf32>
    %119 = arith.mulf %45, %118 : vector<2x384xf32>
    %120 = arith.addf %116, %119 : vector<2x384xf32>
    %c14 = arith.constant 14 : index
    %121 = memref.load %arg3[%c14] : memref<32xf32, #tpu.memory_space<smem>>
    %122 = vector.broadcast %121 : f32 to vector<2x384xf32>
    %123 = arith.mulf %46, %122 : vector<2x384xf32>
    %124 = arith.addf %120, %123 : vector<2x384xf32>
    %c15 = arith.constant 15 : index
    %125 = memref.load %arg3[%c15] : memref<32xf32, #tpu.memory_space<smem>>
    %126 = vector.broadcast %125 : f32 to vector<2x384xf32>
    %127 = arith.mulf %47, %126 : vector<2x384xf32>
    %128 = arith.addf %124, %127 : vector<2x384xf32>
    %c3_33 = arith.constant 3 : index
    %c0_34 = arith.constant 0 : index
    %c0_35 = arith.constant 0 : index
    %129 = vector.load %arg5[%c3_33, %c0_34, %c0_35] : memref<8x2x384xf32, #tpu.memory_space<vmem>>, vector<1x2x384xf32>
    %130 = vector.shape_cast %129 : vector<1x2x384xf32> to vector<2x384xf32>
    %131 = vector.shape_cast %128 : vector<2x384xf32> to vector<1x2x384xf32>
    tpu.vector_store %arg5[%c3_33, %c0_34, %c0_35], %131 {strides = array<i32>} : memref<8x2x384xf32, #tpu.memory_space<vmem>>, vector<1x2x384xf32>,
    %c16 = arith.constant 16 : index
    %132 = memref.load %arg3[%c16] : memref<32xf32, #tpu.memory_space<smem>>
    %133 = vector.broadcast %132 : f32 to vector<2x384xf32>
    %134 = arith.mulf %44, %133 : vector<2x384xf32>
    %c4_36 = arith.constant 4 : index
    %135 = memref.load %arg4[%c4_36] : memref<8xf32, #tpu.memory_space<smem>>
    %136 = vector.broadcast %135 : f32 to vector<2x384xf32>
    %137 = arith.addf %134, %136 : vector<2x384xf32>
    %c17 = arith.constant 17 : index
    %138 = memref.load %arg3[%c17] : memref<32xf32, #tpu.memory_space<smem>>
    %139 = vector.broadcast %138 : f32 to vector<2x384xf32>
    %140 = arith.mulf %45, %139 : vector<2x384xf32>
    %141 = arith.addf %137, %140 : vector<2x384xf32>
    %c18 = arith.constant 18 : index
    %142 = memref.load %arg3[%c18] : memref<32xf32, #tpu.memory_space<smem>>
    %143 = vector.broadcast %142 : f32 to vector<2x384xf32>
    %144 = arith.mulf %46, %143 : vector<2x384xf32>
    %145 = arith.addf %141, %144 : vector<2x384xf32>
    %c19 = arith.constant 19 : index
    %146 = memref.load %arg3[%c19] : memref<32xf32, #tpu.memory_space<smem>>
    %147 = vector.broadcast %146 : f32 to vector<2x384xf32>
    %148 = arith.mulf %47, %147 : vector<2x384xf32>
    %149 = arith.addf %145, %148 : vector<2x384xf32>
    %c4_37 = arith.constant 4 : index
    %c0_38 = arith.constant 0 : index
    %c0_39 = arith.constant 0 : index
    %150 = vector.load %arg5[%c4_37, %c0_38, %c0_39] : memref<8x2x384xf32, #tpu.memory_space<vmem>>, vector<1x2x384xf32>
    %151 = vector.shape_cast %150 : vector<1x2x384xf32> to vector<2x384xf32>
    %152 = vector.shape_cast %149 : vector<2x384xf32> to vector<1x2x384xf32>
    tpu.vector_store %arg5[%c4_37, %c0_38, %c0_39], %152 {strides = array<i32>} : memref<8x2x384xf32, #tpu.memory_space<vmem>>, vector<1x2x384xf32>,
    %c20 = arith.constant 20 : index
    %153 = memref.load %arg3[%c20] : memref<32xf32, #tpu.memory_space<smem>>
    %154 = vector.broadcast %153 : f32 to vector<2x384xf32>
    %155 = arith.mulf %44, %154 : vector<2x384xf32>
    %c5_40 = arith.constant 5 : index
    %156 = memref.load %arg4[%c5_40] : memref<8xf32, #tpu.memory_space<smem>>
    %157 = vector.broadcast %156 : f32 to vector<2x384xf32>
    %158 = arith.addf %155, %157 : vector<2x384xf32>
    %c21 = arith.constant 21 : index
    %159 = memref.load %arg3[%c21] : memref<32xf32, #tpu.memory_space<smem>>
    %160 = vector.broadcast %159 : f32 to vector<2x384xf32>
    %161 = arith.mulf %45, %160 : vector<2x384xf32>
    %162 = arith.addf %158, %161 : vector<2x384xf32>
    %c22 = arith.constant 22 : index
    %163 = memref.load %arg3[%c22] : memref<32xf32, #tpu.memory_space<smem>>
    %164 = vector.broadcast %163 : f32 to vector<2x384xf32>
    %165 = arith.mulf %46, %164 : vector<2x384xf32>
    %166 = arith.addf %162, %165 : vector<2x384xf32>
    %c23 = arith.constant 23 : index
    %167 = memref.load %arg3[%c23] : memref<32xf32, #tpu.memory_space<smem>>
    %168 = vector.broadcast %167 : f32 to vector<2x384xf32>
    %169 = arith.mulf %47, %168 : vector<2x384xf32>
    %170 = arith.addf %166, %169 : vector<2x384xf32>
    %c5_41 = arith.constant 5 : index
    %c0_42 = arith.constant 0 : index
    %c0_43 = arith.constant 0 : index
    %171 = vector.load %arg5[%c5_41, %c0_42, %c0_43] : memref<8x2x384xf32, #tpu.memory_space<vmem>>, vector<1x2x384xf32>
    %172 = vector.shape_cast %171 : vector<1x2x384xf32> to vector<2x384xf32>
    %173 = vector.shape_cast %170 : vector<2x384xf32> to vector<1x2x384xf32>
    tpu.vector_store %arg5[%c5_41, %c0_42, %c0_43], %173 {strides = array<i32>} : memref<8x2x384xf32, #tpu.memory_space<vmem>>, vector<1x2x384xf32>,
    %c24 = arith.constant 24 : index
    %174 = memref.load %arg3[%c24] : memref<32xf32, #tpu.memory_space<smem>>
    %175 = vector.broadcast %174 : f32 to vector<2x384xf32>
    %176 = arith.mulf %44, %175 : vector<2x384xf32>
    %c6_44 = arith.constant 6 : index
    %177 = memref.load %arg4[%c6_44] : memref<8xf32, #tpu.memory_space<smem>>
    %178 = vector.broadcast %177 : f32 to vector<2x384xf32>
    %179 = arith.addf %176, %178 : vector<2x384xf32>
    %c25 = arith.constant 25 : index
    %180 = memref.load %arg3[%c25] : memref<32xf32, #tpu.memory_space<smem>>
    %181 = vector.broadcast %180 : f32 to vector<2x384xf32>
    %182 = arith.mulf %45, %181 : vector<2x384xf32>
    %183 = arith.addf %179, %182 : vector<2x384xf32>
    %c26 = arith.constant 26 : index
    %184 = memref.load %arg3[%c26] : memref<32xf32, #tpu.memory_space<smem>>
    %185 = vector.broadcast %184 : f32 to vector<2x384xf32>
    %186 = arith.mulf %46, %185 : vector<2x384xf32>
    %187 = arith.addf %183, %186 : vector<2x384xf32>
    %c27 = arith.constant 27 : index
    %188 = memref.load %arg3[%c27] : memref<32xf32, #tpu.memory_space<smem>>
    %189 = vector.broadcast %188 : f32 to vector<2x384xf32>
    %190 = arith.mulf %47, %189 : vector<2x384xf32>
    %191 = arith.addf %187, %190 : vector<2x384xf32>
    %c6_45 = arith.constant 6 : index
    %c0_46 = arith.constant 0 : index
    %c0_47 = arith.constant 0 : index
    %192 = vector.load %arg5[%c6_45, %c0_46, %c0_47] : memref<8x2x384xf32, #tpu.memory_space<vmem>>, vector<1x2x384xf32>
    %193 = vector.shape_cast %192 : vector<1x2x384xf32> to vector<2x384xf32>
    %194 = vector.shape_cast %191 : vector<2x384xf32> to vector<1x2x384xf32>
    tpu.vector_store %arg5[%c6_45, %c0_46, %c0_47], %194 {strides = array<i32>} : memref<8x2x384xf32, #tpu.memory_space<vmem>>, vector<1x2x384xf32>,
    %c28 = arith.constant 28 : index
    %195 = memref.load %arg3[%c28] : memref<32xf32, #tpu.memory_space<smem>>
    %196 = vector.broadcast %195 : f32 to vector<2x384xf32>
    %197 = arith.mulf %44, %196 : vector<2x384xf32>
    %c7_48 = arith.constant 7 : index
    %198 = memref.load %arg4[%c7_48] : memref<8xf32, #tpu.memory_space<smem>>
    %199 = vector.broadcast %198 : f32 to vector<2x384xf32>
    %200 = arith.addf %197, %199 : vector<2x384xf32>
    %c29 = arith.constant 29 : index
    %201 = memref.load %arg3[%c29] : memref<32xf32, #tpu.memory_space<smem>>
    %202 = vector.broadcast %201 : f32 to vector<2x384xf32>
    %203 = arith.mulf %45, %202 : vector<2x384xf32>
    %204 = arith.addf %200, %203 : vector<2x384xf32>
    %c30 = arith.constant 30 : index
    %205 = memref.load %arg3[%c30] : memref<32xf32, #tpu.memory_space<smem>>
    %206 = vector.broadcast %205 : f32 to vector<2x384xf32>
    %207 = arith.mulf %46, %206 : vector<2x384xf32>
    %208 = arith.addf %204, %207 : vector<2x384xf32>
    %c31 = arith.constant 31 : index
    %209 = memref.load %arg3[%c31] : memref<32xf32, #tpu.memory_space<smem>>
    %210 = vector.broadcast %209 : f32 to vector<2x384xf32>
    %211 = arith.mulf %47, %210 : vector<2x384xf32>
    %212 = arith.addf %208, %211 : vector<2x384xf32>
    %c7_49 = arith.constant 7 : index
    %c0_50 = arith.constant 0 : index
    %c0_51 = arith.constant 0 : index
    %213 = vector.load %arg5[%c7_49, %c0_50, %c0_51] : memref<8x2x384xf32, #tpu.memory_space<vmem>>, vector<1x2x384xf32>
    %214 = vector.shape_cast %213 : vector<1x2x384xf32> to vector<2x384xf32>
    %215 = vector.shape_cast %212 : vector<2x384xf32> to vector<1x2x384xf32>
    tpu.vector_store %arg5[%c7_49, %c0_50, %c0_51], %215 {strides = array<i32>} : memref<8x2x384xf32, #tpu.memory_space<vmem>>, vector<1x2x384xf32>,
    return
  }
  func.func @transform_0(%arg0: i32) -> (i32, i32) {
    %c0_i32 = arith.constant 0 : i32
    %c0_i32_0 = arith.constant 0 : i32
    %c0_i32_1 = arith.constant 0 : i32
    return %c0_i32, %c0_i32_0 : i32, i32
  }
  func.func @transform_1(%arg0: i32) -> (i32, i32) {
    %c0_i32 = arith.constant 0 : i32
    %c0_i32_0 = arith.constant 0 : i32
    %c0_i32_1 = arith.constant 0 : i32
    return %c0_i32, %c0_i32_0 : i32, i32
  }
  func.func @transform_2(%arg0: i32) -> i32 {
    %c0_i32 = arith.constant 0 : i32
    %c0_i32_0 = arith.constant 0 : i32
    return %c0_i32 : i32
  }
  func.func @transform_3(%arg0: i32) -> i32 {
    %c0_i32 = arith.constant 0 : i32
    %c0_i32_0 = arith.constant 0 : i32
    return %c0_i32 : i32
  }
  func.func @transform_4(%arg0: i32) -> (i32, i32, i32) {
    %c0_i32 = arith.constant 0 : i32
    %c0_i32_0 = arith.constant 0 : i32
    %c0_i32_1 = arith.constant 0 : i32
    %c0_i32_2 = arith.constant 0 : i32
    return %c0_i32, %c0_i32_0, %c0_i32_1 : i32, i32, i32
  }
}

</mosaic_0001>

<bundles_post_ra>
// kernel: tpu_custom_call.1
= control target key start
LH: loop header
LB: loop body
LE: loop exit
PB: predicated region body
PF: predicated region fallthrough
CT: control target
= control target key end

     0   :  { %9 = vsyncpa [#allocation3], 0  ;;  %s1796_s0 = inlined_call_operand.hbm [shape: f32[8,384], index: 0, kind: input, shape index: {}]   ;;  %s1797_s1 = inlined_call_operand.hbm [shape: f32[8,9], index: 1, kind: input, shape index: {}]   ;;  %s1798_s2 = inlined_call_operand.vmem [shape: f32[32], index: 2, kind: input, shape index: {}]   ;;  %s1799_s3 = inlined_call_operand.vmem [shape: f32[8], index: 3, kind: input, shape index: {}]   ;;  %s1800_s4 = inlined_call_operand.hbm [shape: f32[8,2,384], index: 4, kind: output, shape index: {}]  }
   0x1   :  { %10 = vsyncpa [#allocation7], 0 }
   0x2   :  { %11 = vsyncpa [#allocation5], 0 }
   0x3   :  { %12 = vsyncpa [#allocation10], 0 }
   0x4   :  { %13 = vsyncpa [#allocation4], 0  ;;  %s1091_s15 = smov [#allocation2]   ;;  %s1092_s17 = smov [#allocation6]  }
   0x5   :  { %s20_s16 = sshll.u32 %s1091_s15, 4  ;;  %s30_s18 = sshll.u32 %s1092_s17, 4  ;;  %s21_s16 = int_to_ptr.vmem [resolvable:$true] %s20_s16  ;;  %s31_s18 = int_to_ptr.vmem [resolvable:$true] %s30_s18 }
   0x6   :  { %s1005_s19 = scalar_lea.vmem %s21_s16, 384  ;;  %p1010_p1 = scmp.lt.s32.totalorder %s21_s16, %s21_s16 }
   0x7   :  { %p1006_p0 = scmp.ne.s32.totalorder %s21_s16, %s1005_s19  ;;  %p1011_p2 = scmp.lt.s32.totalorder %s1005_s19, %s1005_s19 }
   0x9   :  { %p1012_p3 = por %p1011_p2, %p1010_p1 }
   0xb   :  { %p1013_p4 = pnand %p1012_p3, %p1006_p0 }
   0xd   :  { %1016 = shalt.err (!%p1013_p4)
}
   0xe   :  { %23 = dma.hbm_to_vmem [thread:$0]  %s1796_s0, 384, %s21_s16, [#allocation3]  }
   0xf   :  { %s1025_s22 = scalar_lea.vmem %s31_s18, 128  ;;  %p1030_p6 = scmp.lt.s32.totalorder %s31_s18, %s31_s18 }
  0x10   :  { %p1026_p5 = scmp.ne.s32.totalorder %s31_s18, %s1025_s22  ;;  %p1031_p7 = scmp.lt.s32.totalorder %s1025_s22, %s1025_s22 }
  0x12   :  { %p1032_p8 = por %p1031_p7, %p1030_p6 }
  0x14   :  { %p1033_p9 = pnand %p1032_p8, %p1026_p5 }
  0x16   :  { %1036 = shalt.err (!%p1033_p9)
}
  0x17   :  { %33 = dma.hbm_to_vmem [thread:$0]  %s1797_s1, 128, %s31_s18, [#allocation7]  }
  0x18   :  { %s40_s27 = sshll.u32 %s1798_s2, 4  ;;  %s50_s0 = sshll.u32 %s1799_s3, 4  ;;  %s41_s27 = int_to_ptr.vmem [resolvable:$true] %s40_s27  ;;  %s51_s0 = int_to_ptr.vmem [resolvable:$true] %s50_s0 }
  0x19   :  { %s1037_s30 = scalar_lea.vmem %s41_s27, 16  ;;  %p1042_p11 = scmp.lt.s32.totalorder %s41_s27, %s41_s27 }
  0x1a   :  { %p1038_p10 = scmp.ne.s32.totalorder %s41_s27, %s1037_s30  ;;  %p1043_p12 = scmp.lt.s32.totalorder %s1037_s30, %s1037_s30 }
  0x1c   :  { %p1044_p13 = por %p1043_p12, %p1042_p11 }
  0x1e   :  { %p1045_p0 = pnand %p1044_p13, %p1038_p10 }
  0x20   :  { %1048 = shalt.err (!%p1045_p0)
}
  0x21   :  { %s1093_s5 = smov [#allocation8]   ;;  %s1049_s1 = scalar_lea.vmem %s51_s0, 16 }
  0x22   :  { %43 = dma.vmem_to_smem %s41_s27, 16, %s1093_s5, [#allocation5]  }
  0x23   :  { %p1050_p1 = scmp.ne.s32.totalorder %s51_s0, %s1049_s1  ;;  %p1054_p2 = scmp.lt.s32.totalorder %s51_s0, %s51_s0 }
  0x24   :  { %p1055_p3 = scmp.lt.s32.totalorder %s1049_s1, %s1049_s1 }
  0x26   :  { %p1056_p4 = por %p1055_p3, %p1054_p2 }
  0x28   :  { %p1057_p5 = pnand %p1056_p4, %p1050_p1 }
  0x2a   :  { %1060 = shalt.err (!%p1057_p5)
}
  0x2b   :  { %s1094_s2 = smov [#allocation9]  }
  0x2c   :  { %53 = dma.vmem_to_smem %s51_s0, 16, %s1094_s2, [#allocation10]  }
  0x2d   :  { %1081 = dma.done.wait [#allocation3], 384  }
  0x2e   :  { %1082 = vsyncadd [#allocation3], 4294966912 }
  0x2f   :  { %1083 = dma.done.wait [#allocation7], 128  }
  0x30   :  { %1084 = vsyncadd [#allocation7], 4294967168 }
  0x31   :  { %1085 = dma.done.wait [#allocation5], 16  }
  0x32   :  { %1086 = vsyncadd [#allocation5], 4294967280 }
  0x33   :  { %1087 = dma.done.wait [#allocation10], 16  }
  0x34   :  { %1088 = vsyncadd [#allocation10], 4294967280 }
  0x35   :  { %66 = sfence }
  0x36   :  { %v70_v0 = vld [vmem:[#allocation6] sm:$0xff]  ;;  %v1095_v1 = vmov 2   ;;  %v1096_v2 = vmov 0   ;;  %v1153_v3 = vld [vmem:[#allocation2] sm:$0xff]  ;;  %v1097_v4 = vmov 1   ;;  %s1098_s3 = smov 127   ;;  %v85_v28 = vlaneseq }
  0x37   :  { %989 = vset.pattern.permute.xlu1 %v1095_v1  ;;  %987 = vset.pattern.permute.xlu0 %v1096_v2  ;;  %v1156_v5 = vld [vmem:[#allocation2 + $0x8] sm:$0xff]  ;;  %v1099_v6 = vmov 3   ;;  %v1158_v7 = vld [vmem:[#allocation2 + $0x10] sm:$0xff]  ;;  %v1100_v8 = vmov 8   ;;  %s1101_s6 = smov 126   ;;  %v1102_v9 = vmov 4  }
  0x38   :  { %112 = vperm.xlu1 %989, %v70_v0   ;;  %73 = vperm.xlu0 %987, %v70_v0   ;;  %s1103_s7 = smov 110   ;;  %v1104_v10 = vmov 5   ;;  %s1105_s8 = smov 109   ;;  %v1106_v11 = vmov 6   ;;  %v1108_v12 = vmov 7   ;;  %v1261_v33 = vand.u32 127, %v85_v28 }
  0x39   :  { %s1107_s9 = smov 108   ;;  %s1109_s10 = smov 92   ;;  %v1112_v29 = vmov 1983009808   ;;  %v310_v35 = vshrl.u32 %v85_v28, 7 }
  0x3a   :  { %s1110_s11 = smov 91   ;;  %s1111_s12 = smov 90   ;;  %v307_v30 = vunpack.c.l.s4 %v1112_v29  ;;  %vm87_vm0 = vcmp.lt.s32.totalorder %v1261_v33, 127  ;;  %vm107_vm1 = vcmp.lt.s32.totalorder %v1261_v33, 126  ;;  %vm127_vm2 = vcmp.lt.s32.totalorder %v1261_v33, 110 }
  0x3b   :  { %s1195_s13 = sld [smem:[#allocation8]]  ;;  %vm147_vm3 = vcmp.lt.s32.totalorder %v1261_v33, 109  ;;  %vm167_vm4 = vcmp.lt.s32.totalorder %v1261_v33, 108  ;;  %vm187_vm5 = vcmp.lt.s32.totalorder %v1261_v33, 92  ;;  %vm207_vm6 = vcmp.lt.s32.totalorder %v1261_v33, 91 }
  0x3c   :  { %988 = vset.pattern.permute.xlu0 %v1097_v4  ;;  %79 = vrot.lane.b32.xlu1 %v1153_v3, %s1098_s3  ;;  %s1199_s14 = sld [smem:[#allocation8 + $0x1]]  ;;  %v308_v34 = vunpack.c.0.s8 %v307_v30  ;;  %vm227_vm7 = vcmp.lt.s32.totalorder %v1261_v33, 90 }
  0x3d   :  { %92 = vperm.xlu0 %988, %v70_v0   ;;  %990 = vset.pattern.permute.xlu1 %v1099_v6  ;;  %s1203_s15 = sld [smem:[#allocation9]] }
  0x3e   :  { %s1205_s16 = sld [smem:[#allocation8 + $0x2]]  ;;  %v1276_v38 = vsub.s32 %v308_v34, %v310_v35 }
  0x3f   :  { %s1207_s17 = sld [smem:[#allocation8 + $0x3]] }
  0x40   :  { %81 = vrot.lane.b32.xlu1 %v1156_v5, %s1098_s3  ;;  %s1211_s18 = sld [smem:[#allocation8 + $0x4]] }
  0x41   :  { %83 = vrot.lane.b32.xlu0 %v1158_v7, %s1098_s3  ;;  %s1215_s19 = sld [smem:[#allocation8 + $0x5]]  ;;  %v1286_v40 = vstv %s1195_s13 }
  0x42   :  { %996 = vset.pattern.permute.xlu0 %v1100_v8  ;;  %s1217_s20 = sld [smem:[#allocation9 + $0x1]]  ;;  %v1294_v42 = vstv %s1199_s14 }
  0x43   :  { %s1219_s21 = sld [smem:[#allocation8 + $0x6]]  ;;  %v1291_v41 = vstv %s1203_s15 }
  0x44   :  { %132 = vperm.xlu1 %990, %v70_v0   ;;  %s1223_s22 = sld [smem:[#allocation8 + $0x7]]  ;;  %v1297_v43 = vstv %s1205_s16 }
  0x45   :  { %101 = vrot.lane.b32.xlu0 %v1153_v3, %s1101_s6  ;;  %s1227_s23 = sld [smem:[#allocation8 + $0x8]]  ;;  %v1300_v44 = vstv %s1207_s17 }
  0x46   :  { %s1229_s24 = sld [smem:[#allocation8 + $0x9]]  ;;  %v1307_v46 = vstv %s1211_s18 }
  0x47   :  { %s1231_s25 = sld [smem:[#allocation9 + $0x2]]  ;;  %v1313_v48 = vstv %s1215_s19 }
  0x48   :  { %103 = vrot.lane.b32.xlu1 %v1156_v5, %s1101_s6  ;;  %s1235_s26 = sld [smem:[#allocation8 + $0xa]]  ;;  %v1310_v47 = vstv %s1217_s20 }
  0x49   :  { %991 = vset.pattern.permute.xlu1 %v1102_v9  ;;  %105 = vrot.lane.b32.xlu0 %v1158_v7, %s1101_s6  ;;  %s1239_s27 = sld [smem:[#allocation8 + $0xb]]  ;;  %v1316_v49 = vstv %s1219_s21 }
  0x4a   :  { %s1241_s28 = sld [smem:[#allocation8 + $0xc]]  ;;  %v1322_v51 = vstv %s1223_s22 }
  0x4b   :  { %s1243_s29 = sld [smem:[#allocation8 + $0xd]]  ;;  %v1325_v52 = vstv %s1227_s23  ;;  %s1113_s23 = smov [#allocation11]  }
  0x4c   :  { %152 = vperm.xlu1 %991, %v70_v0   ;;  %s1247_s0 = sld [smem:[#allocation9 + $0x3]]  ;;  %v1331_v54 = vstv %s1229_s24  ;;  %s909_s24 = sshll.u32 %s1113_s23, 4  ;;  %s910_s24 = int_to_ptr.vmem [resolvable:$true] %s909_s24 }
  0x4d   :  { %121 = vrot.lane.b32.xlu0 %v1153_v3, %s1103_s7  ;;  %s1251_s30 = sld [smem:[#allocation8 + $0xe]]  ;;  %v1328_v53 = vstv %s1231_s25  ;;  %s1061_s25 = scalar_lea.vmem %s910_s24, 768 }
  0x4e   :  { %s1253_s5 = sld [smem:[#allocation8 + $0xf]]  ;;  %v1334_v55 = vstv %s1235_s26  ;;  %p1062_p6 = scmp.ne.s32.totalorder %s910_s24, %s1061_s25 }
  0x4f   :  { %s1255_s1 = sld [smem:[#allocation8 + $0x10]]  ;;  %v1337_v56 = vstv %s1239_s27  ;;  %p1066_p7 = scmp.lt.s32.totalorder %s910_s24, %s910_s24 }
  0x50   :  { %123 = vrot.lane.b32.xlu1 %v1156_v5, %s1103_s7  ;;  %s1259_s2 = sld [smem:[#allocation8 + $0x11]]  ;;  %v1340_v57 = vstv %s1241_s28  ;;  %p1067_p8 = scmp.lt.s32.totalorder %s1061_s25, %s1061_s25 }
  0x51   :  { %992 = vset.pattern.permute.xlu1 %v1104_v10  ;;  %125 = vrot.lane.b32.xlu0 %v1158_v7, %s1103_s7  ;;  %s1265_s3 = sld [smem:[#allocation8 + $0x12]]  ;;  %v1343_v58 = vstv %s1243_s29 }
  0x52   :  { %s1267_s6 = sld [smem:[#allocation9 + $0x4]]  ;;  %v1353_v60 = vstv %s1247_s0  ;;  %p1068_p9 = por %p1067_p8, %p1066_p7 }
  0x53   :  { %s1269_s7 = sld [smem:[#allocation8 + $0x13]]  ;;  %v1356_v61 = vstv %s1251_s30 }
  0x54   :  { %172 = vperm.xlu1 %992, %v70_v0   ;;  %v1359_v62 = vstv %s1253_s5  ;;  %s1415_s13 = sld [smem:[#allocation8 + $0x18]]  ;;  %p1069_p10 = pnand %p1068_p9, %p1062_p6 }
  0x55   :  { %141 = vrot.lane.b32.xlu0 %v1153_v3, %s1105_s8  ;;  %v1368_v1 = vstv %s1255_s1  ;;  %s1436_s14 = sld [smem:[#allocation8 + $0x19]] }
  0x56   :  { %v1371_v2 = vstv %s1259_s2  ;;  %s1444_s15 = sld [smem:[#allocation9 + $0x6]] }
  0x57   :  { %v1374_v4 = vstv %s1265_s3  ;;  %s1456_s16 = sld [smem:[#allocation8 + $0x1a]] }
  0x58   :  { %143 = vrot.lane.b32.xlu1 %v1156_v5, %s1105_s8  ;;  %v1383_v9 = vstv %s1267_s6  ;;  %s1466_s17 = sld [smem:[#allocation8 + $0x1b]] }
  0x59   :  { %993 = vset.pattern.permute.xlu1 %v1106_v11  ;;  %145 = vrot.lane.b32.xlu0 %v1158_v7, %s1105_s8  ;;  %s1273_s8 = sld [smem:[#allocation8 + $0x14]]  ;;  %v1386_v10 = vstv %s1269_s7 }
  0x5a   :  { %s1476_s18 = sld [smem:[#allocation8 + $0x1c]] }
  0x5b   :  { %s1483_s19 = sld [smem:[#allocation8 + $0x1d]] }
  0x5c   :  { %192 = vperm.xlu1 %993, %v70_v0   ;;  %s1493_s20 = sld [smem:[#allocation9 + $0x7]] }
  0x5d   :  { %161 = vrot.lane.b32.xlu0 %v1153_v3, %s1107_s9  ;;  %s1497_s21 = sld [smem:[#allocation8 + $0x1e]] }
  0x5e   :  { %s1507_s22 = sld [smem:[#allocation8 + $0x1f]] }
  0x5f   :  { %v1389_v11 = vstv %s1273_s8 }
  0x60   :  { %163 = vrot.lane.b32.xlu1 %v1156_v5, %s1107_s9  ;;  %1805 = vst [vmem:[#allocation17_spill] sm:$0xff] %v1389_v11 }
  0x61   :  { %994 = vset.pattern.permute.xlu1 %v1108_v12  ;;  %165 = vrot.lane.b32.xlu0 %v1158_v7, %s1107_s9  ;;  %s1280_s9 = sld [smem:[#allocation8 + $0x15]] }
  0x64   :  { %212 = vperm.xlu1 %994, %v70_v0  }
  0x65   :  { %181 = vrot.lane.b32.xlu0 %v1153_v3, %s1109_s10 }
  0x67   :  { %v1402_v29 = vstv %s1280_s9 }
  0x68   :  { %183 = vrot.lane.b32.xlu1 %v1156_v5, %s1109_s10  ;;  %1806 = vst [vmem:[#allocation18_spill] sm:$0xff] %v1402_v29 }
  0x69   :  { %995 = vset.pattern.permute.xlu1 %v1100_v8  ;;  %185 = vrot.lane.b32.xlu0 %v1158_v7, %s1109_s10  ;;  %s1288_s10 = sld [smem:[#allocation9 + $0x5]] }
  0x6c   :  { %232 = vperm.xlu1 %995, %v70_v0  }
  0x6d   :  { %201 = vrot.lane.b32.xlu0 %v1153_v3, %s1110_s11 }
  0x6f   :  { %v1410_v35 = vstv %s1288_s10 }
  0x70   :  { %203 = vrot.lane.b32.xlu1 %v1156_v5, %s1110_s11  ;;  %1807 = vst [vmem:[#allocation19_spill] sm:$0xff] %v1410_v35 }
  0x71   :  { %205 = vrot.lane.b32.xlu0 %v1158_v7, %s1110_s11  ;;  %s1302_s11 = sld [smem:[#allocation8 + $0x16]] }
  0x74   :  { %221 = vrot.lane.b32.xlu1 %v1153_v3, %s1111_s12 }
  0x75   :  { %223 = vrot.lane.b32.xlu0 %v1156_v5, %s1111_s12 }
  0x78   :  { %225 = vrot.lane.b32.xlu1 %v1158_v7, %s1111_s12  ;;  %s1345_s12 = sld [smem:[#allocation8 + $0x17]] }
  0xb3   :  { %v1183_v13 = vpop.permute.xlu1 %112  ;;  %v1185_v14 = vpop.permute.xlu0 %73 }
  0xb7   :  { %v1187_v15 = vpop.permute.xlu1 %79 }
  0xb8   :  { %v1189_v16 = vpop.permute.xlu0 %92 }
  0xbb   :  { %v1191_v17 = vpop.permute.xlu1 %81 }
  0xbc   :  { %v1193_v18 = vpop.permute.xlu0 %83  ;;  %v89_v59 = vsel %vm87_vm0, %v1187_v15, %v1191_v17 }
  0xbd   :  { %v88_v63 = vsel %vm87_vm0, %v1191_v17, %v1193_v18  ;;  %v95_v12 = vmul.f32 %v1189_v16, %v89_v59  ;;  %v90_v17 = vsel %vm87_vm0, %v1193_v18, %v1187_v15  ;;  %v1413_v59 = vstv %s1302_s11 }
  0xbe   :  { %v96_v30 = vmul.f32 %v1189_v16, %v88_v63  ;;  %1808 = vst [vmem:[#allocation20_spill] sm:$0xff] %v1413_v59  ;;  %v76_v15 = vmul.f32 %v1185_v14, %v1153_v3  ;;  %v77_v18 = vmul.f32 %v1185_v14, %v1156_v5  ;;  %v97_v35 = vmul.f32 %v1189_v16, %v90_v17 }
  0xbf   :  { %v1197_v19 = vpop.permute.xlu1 %132  ;;  %v1442_v17 = vstv %s1345_s12 }
  0xc0   :  { %v1201_v20 = vpop.permute.xlu0 %101 }
  0xc3   :  { %v1209_v21 = vpop.permute.xlu1 %103 }
  0xc4   :  { %v1213_v22 = vpop.permute.xlu0 %105  ;;  %v109_v6 = vsel %vm107_vm1, %v1201_v20, %v1209_v21 }
  0xc5   :  { %v108_v28 = vsel %vm107_vm1, %v1209_v21, %v1213_v22  ;;  %v115_v21 = vmul.f32 %v1183_v13, %v109_v6  ;;  %v110_v63 = vsel %vm107_vm1, %v1213_v22, %v1201_v20  ;;  %v78_v20 = vmul.f32 %v1185_v14, %v1158_v7 }
  0xc6   :  { %v116_v59 = vmul.f32 %v1183_v13, %v108_v28  ;;  %v98_v22 = vadd.f32 %v95_v12, %v76_v15  ;;  %v99_v28 = vadd.f32 %v96_v30, %v77_v18 }
  0xc7   :  { %v1221_v23 = vpop.permute.xlu1 %152 }
  0xc8   :  { %v1225_v24 = vpop.permute.xlu0 %121  ;;  %v118_v14 = vadd.f32 %v115_v21, %v98_v22 }
  0xcb   :  { %v1233_v25 = vpop.permute.xlu1 %123 }
  0xcc   :  { %v1237_v26 = vpop.permute.xlu0 %125  ;;  %v129_v34 = vsel %vm127_vm2, %v1225_v24, %v1233_v25 }
  0xcd   :  { %v128_v3 = vsel %vm127_vm2, %v1233_v25, %v1237_v26  ;;  %v135_v16 = vmul.f32 %v1197_v19, %v129_v34  ;;  %v117_v25 = vmul.f32 %v1183_v13, %v110_v63  ;;  %v130_v11 = vsel %vm127_vm2, %v1237_v26, %v1225_v24 }
  0xce   :  { %v136_v12 = vmul.f32 %v1197_v19, %v128_v3  ;;  %v100_v26 = vadd.f32 %v97_v35, %v78_v20  ;;  %v137_v63 = vmul.f32 %v1197_v19, %v130_v11 }
  0xcf   :  { %v1245_v27 = vpop.permute.xlu1 %172  ;;  %v138_v21 = vadd.f32 %v135_v16, %v118_v14 }
  0xd0   :  { %v1249_v31 = vpop.permute.xlu0 %141 }
  0xd3   :  { %v1257_v32 = vpop.permute.xlu1 %143 }
  0xd4   :  { %v1263_v36 = vpop.permute.xlu0 %145  ;;  %v149_v5 = vsel %vm147_vm3, %v1249_v31, %v1257_v32 }
  0xd5   :  { %v148_v7 = vsel %vm147_vm3, %v1257_v32, %v1263_v36  ;;  %v155_v30 = vmul.f32 %v1221_v23, %v149_v5  ;;  %v119_v32 = vadd.f32 %v116_v59, %v99_v28  ;;  %v150_v34 = vsel %vm147_vm3, %v1263_v36, %v1249_v31 }
  0xd6   :  { %v156_v3 = vmul.f32 %v1221_v23, %v148_v7  ;;  %v120_v31 = vadd.f32 %v117_v25, %v100_v26  ;;  %v1491_v59 = vstv %s1415_s13  ;;  %v157_v5 = vmul.f32 %v1221_v23, %v150_v34 }
  0xd7   :  { %v1271_v37 = vpop.permute.xlu1 %192  ;;  %v139_v19 = vadd.f32 %v136_v12, %v119_v32  ;;  %v158_v11 = vadd.f32 %v155_v30, %v138_v21  ;;  %v1511_v12 = vstv %s1436_s14 }
  0xd8   :  { %v1278_v39 = vpop.permute.xlu0 %161  ;;  %v140_v23 = vadd.f32 %v137_v63, %v120_v31 }
  0xd9   :  { %v159_v7 = vadd.f32 %v156_v3, %v139_v19  ;;  %v1524_v3 = vstv %s1456_s16 }
  0xdb   :  { %v1304_v45 = vpop.permute.xlu1 %163 }
  0xdc   :  { %v1319_v50 = vpop.permute.xlu0 %165  ;;  %v169_v13 = vsel %vm167_vm4, %v1278_v39, %v1304_v45 }
  0xdd   :  { %v168_v15 = vsel %vm167_vm4, %v1304_v45, %v1319_v50  ;;  %v175_v36 = vmul.f32 %v1245_v27, %v169_v13  ;;  %v170_v45 = vsel %vm167_vm4, %v1319_v50, %v1278_v39  ;;  %v160_v13 = vadd.f32 %v157_v5, %v140_v23 }
  0xde   :  { %v176_v20 = vmul.f32 %v1245_v27, %v168_v15  ;;  %v177_v14 = vmul.f32 %v1245_v27, %v170_v45  ;;  %v1521_v27 = vstv %s1444_s15  ;;  %v1538_v5 = vstv %s1483_s19 }
  0xdf   :  { %v1365_v0 = vpop.permute.xlu1 %212  ;;  %v1553_v23 = vstv %s1507_s22 }
  0xe0   :  { %v1380_v8 = vpop.permute.xlu0 %181  ;;  %v179_v15 = vadd.f32 %v176_v20, %v159_v7 }
  0xe3   :  { %v184_v29 = vpop.permute.xlu1 %183 }
  0xe4   :  { %v186_v6 = vpop.permute.xlu0 %185  ;;  %v189_v35 = vsel %vm187_vm5, %v1380_v8, %v184_v29 }
  0xe5   :  { %v195_v16 = vmul.f32 %v1271_v37, %v189_v35  ;;  %v188_v28 = vsel %vm187_vm5, %v184_v29, %v186_v6  ;;  %v190_v39 = vsel %vm187_vm5, %v186_v6, %v1380_v8  ;;  %v178_v29 = vadd.f32 %v175_v36, %v158_v11 }
  0xe6   :  { %v196_v26 = vmul.f32 %v1271_v37, %v188_v28  ;;  %v197_v32 = vmul.f32 %v1271_v37, %v190_v39  ;;  %v1527_v35 = vstv %s1466_s17  ;;  %v1535_v11 = vstv %s1476_s18 }
  0xe7   :  { %v1464_v24 = vpop.permute.xlu1 %232  ;;  %v198_v21 = vadd.f32 %v195_v16, %v178_v29  ;;  %v1541_v28 = vstv %s1493_s20  ;;  %v1544_v39 = vstv %s1497_s21 }
  0xe8   :  { %v202_v18 = vpop.permute.xlu0 %201  ;;  %v199_v20 = vadd.f32 %v196_v26, %v179_v15 }
  0xeb   :  { %v204_v22 = vpop.permute.xlu1 %203 }
  0xec   :  { %v209_v50 = vsel %vm207_vm6, %v202_v18, %v204_v22  ;;  %v206_v25 = vpop.permute.xlu0 %205 }
  0xed   :  { %v215_v30 = vmul.f32 %v1365_v0, %v209_v50  ;;  %v208_v8 = vsel %vm207_vm6, %v204_v22, %v206_v25  ;;  %v210_v6 = vsel %vm207_vm6, %v206_v25, %v202_v18  ;;  %v180_v18 = vadd.f32 %v177_v14, %v160_v13 }
  0xee   :  { %v216_v31 = vmul.f32 %v1365_v0, %v208_v8  ;;  %v217_v36 = vmul.f32 %v1365_v0, %v210_v6 }
  0xef   :  { %v222_v34 = vpop.permute.xlu1 %221  ;;  %v218_v45 = vadd.f32 %v215_v30, %v198_v21  ;;  %v200_v22 = vadd.f32 %v197_v32, %v180_v18 }
  0xf0   :  { %v224_v63 = vpop.permute.xlu0 %223  ;;  %v219_v7 = vadd.f32 %v216_v31, %v199_v20 }
  0xf1   :  { %v229_v37 = vsel %vm227_vm7, %v222_v34, %v224_v63  ;;  %v220_v14 = vadd.f32 %v217_v36, %v200_v22 }
  0xf2   :  { %v235_v19 = vmul.f32 %v1464_v24, %v229_v37 }
  0xf3   :  { %v226_v16 = vpop.permute.xlu1 %225 }
  0xf4   :  { %v1546_v50 = vadd.f32 %v235_v19, %v218_v45  ;;  %v228_v0 = vsel %vm227_vm7, %v224_v63, %v226_v16  ;;  %v230_v25 = vsel %vm227_vm7, %v226_v16, %v222_v34 }
  0xf5   :  { %v236_v29 = vmul.f32 %v1464_v24, %v228_v0  ;;  %v237_v30 = vmul.f32 %v1464_v24, %v230_v25 }
  0xf6   :  { %v243_v8 = vmul.f32 %v1286_v40, %v1546_v50  ;;  %v253_v6 = vmul.f32 %v1294_v42, %v1546_v50  ;;  %v270_v13 = vmul.f32 %v1297_v43, %v1546_v50  ;;  %v287_v33 = vmul.f32 %v1300_v44, %v1546_v50 }
  0xf7   :  { %v1565_v26 = vadd.f32 %v236_v29, %v219_v7  ;;  %v1567_v32 = vadd.f32 %v237_v30, %v220_v14  ;;  %v325_v34 = vmul.f32 %v1307_v46, %v1546_v50  ;;  %v335_v24 = vmul.f32 %v1313_v48, %v1546_v50 }
  0xf8   :  { %v248_v15 = vadd.f32 %v1291_v41, %v243_v8  ;;  %v259_v21 = vrot.slane %v253_v6, 2  ;;  %v276_v63 = vrot.slane %v270_v13, 4  ;;  %v293_v18 = vrot.slane %v287_v33, 6 }
  0xf9   :  { %v244_v31 = vmul.f32 %v1286_v40, %v1565_v26  ;;  %v245_v36 = vmul.f32 %v1286_v40, %v1567_v32  ;;  %v254_v37 = vmul.f32 %v1294_v42, %v1565_v26  ;;  %v255_v45 = vmul.f32 %v1294_v42, %v1567_v32 }
  0xfa   :  { %v265_v19 = vadd.f32 %v259_v21, %v248_v15  ;;  %v271_v20 = vmul.f32 %v1297_v43, %v1565_v26  ;;  %v272_v22 = vmul.f32 %v1297_v43, %v1567_v32  ;;  %v288_v16 = vmul.f32 %v1300_v44, %v1565_v26 }
  0xfb   :  { %v249_v0 = vadd.f32 %v1291_v41, %v244_v31  ;;  %v250_v40 = vadd.f32 %v1291_v41, %v245_v36  ;;  %v260_v25 = vrot.slane %v254_v37, 2  ;;  %v261_v7 = vrot.slane %v255_v45, 2 }
  0xfc   :  { %v277_v14 = vrot.slane %v271_v20, 4  ;;  %v278_v29 = vrot.slane %v272_v22, 4  ;;  %v282_v30 = vadd.f32 %v276_v63, %v265_v19  ;;  %v289_v42 = vmul.f32 %v1300_v44, %v1567_v32 }
  0xfd   :  { %v266_v8 = vadd.f32 %v260_v25, %v249_v0  ;;  %v267_v6 = vadd.f32 %v261_v7, %v250_v40  ;;  %v294_v13 = vrot.slane %v288_v16, 6  ;;  %v326_v43 = vmul.f32 %v1307_v46, %v1565_v26 }
  0xfe   :  { %v295_v33 = vrot.slane %v289_v42, 6  ;;  %v299_v15 = vadd.f32 %v293_v18, %v282_v30  ;;  %v327_v21 = vmul.f32 %v1307_v46, %v1567_v32  ;;  %v330_v41 = vadd.f32 %v1310_v47, %v325_v34 }
  0xff   :  { %v283_v31 = vadd.f32 %v277_v14, %v266_v8  ;;  %v284_v36 = vadd.f32 %v278_v29, %v267_v6  ;;  %v331_v63 = vadd.f32 %v1310_v47, %v326_v43  ;;  %v336_v44 = vmul.f32 %v1313_v48, %v1565_v26 }
 0x100   :  { %v332_v37 = vadd.f32 %v1310_v47, %v327_v21  ;;  %v337_v45 = vmul.f32 %v1313_v48, %v1567_v32  ;;  %v341_v19 = vrot.slane %v335_v24, 2  ;;  %v352_v18 = vmul.f32 %v1316_v49, %v1546_v50 }
 0x101   :  { %v300_v20 = vadd.f32 %v294_v13, %v283_v31  ;;  %v301_v46 = vadd.f32 %v295_v33, %v284_v36  ;;  %v342_v22 = vrot.slane %v336_v44, 2  ;;  %v353_v34 = vmul.f32 %v1316_v49, %v1565_v26 }
 0x102   :  { %v343_v16 = vrot.slane %v337_v45, 2  ;;  %v347_v0 = vadd.f32 %v341_v19, %v330_v41  ;;  %v354_v40 = vmul.f32 %v1316_v49, %v1567_v32  ;;  %v358_v25 = vrot.slane %v352_v18, 4 }
 0x103   :  { %v305_v47 = vcombine.low %v299_v15, %v300_v20  ;;  %v319_v7 = vrot.slane %v301_v46, %v1276_v38  ;;  %v348_v48 = vadd.f32 %v342_v22, %v331_v63  ;;  %v359_v24 = vrot.slane %v353_v34, 4 }
 0x104   :  { %v349_v14 = vadd.f32 %v343_v16, %v332_v37  ;;  %v360_v29 = vrot.slane %v354_v40, 4  ;;  %v364_v30 = vadd.f32 %v358_v25, %v347_v0  ;;  %v369_v42 = vmul.f32 %v1322_v51, %v1546_v50 }
 0x105   :  { %v312_v8 = vrot.slane %v305_v47, %v1276_v38  ;;  %v365_v6 = vadd.f32 %v359_v24, %v348_v48  ;;  %v370_v13 = vmul.f32 %v1322_v51, %v1565_v26  ;;  %v371_v49 = vmul.f32 %v1322_v51, %v1567_v32 }
 0x106   :  { %v366_v43 = vadd.f32 %v360_v29, %v349_v14  ;;  %v375_v33 = vrot.slane %v369_v42, 6  ;;  %v408_v15 = vmul.f32 %v1325_v52, %v1546_v50  ;;  %v409_v21 = vmul.f32 %v1325_v52, %v1565_v26 }
 0x107   :  { %v320_v41 = vcombine.low %v312_v8, %v319_v7  ;;  %v376_v31 = vrot.slane %v370_v13, 6  ;;  %v377_v36 = vrot.slane %v371_v49, 6  ;;  %v410_v63 = vmul.f32 %v1325_v52, %v1567_v32 }
 0x108   :  { %v381_v44 = vadd.f32 %v375_v33, %v364_v30  ;;  %v413_v37 = vadd.f32 %v1328_v53, %v408_v15  ;;  %v414_v45 = vadd.f32 %v1328_v53, %v409_v21  ;;  %v418_v51 = vmul.f32 %v1331_v54, %v1546_v50 }
 0x109   :  { %322 = vst [vmem:[#allocation11] sm:$0x3f] %v320_v41  ;;  %v382_v19 = vadd.f32 %v376_v31, %v365_v6  ;;  %v383_v18 = vadd.f32 %v377_v36, %v366_v43  ;;  %v415_v20 = vadd.f32 %v1328_v53, %v410_v63  ;;  %v419_v46 = vmul.f32 %v1331_v54, %v1565_v26 }
 0x10a   :  { %v420_v22 = vmul.f32 %v1331_v54, %v1567_v32  ;;  %v424_v52 = vrot.slane %v418_v51, 2  ;;  %v435_v34 = vmul.f32 %v1334_v55, %v1546_v50  ;;  %v436_v16 = vmul.f32 %v1334_v55, %v1565_v26 }
 0x10b   :  { %v387_v0 = vcombine.low %v381_v44, %v382_v19  ;;  %v401_v40 = vrot.slane %v383_v18, %v1276_v38  ;;  %v425_v25 = vrot.slane %v419_v46, 2  ;;  %v437_v53 = vmul.f32 %v1334_v55, %v1567_v32 }
 0x10c   :  { %v426_v47 = vrot.slane %v420_v22, 2  ;;  %v430_v7 = vadd.f32 %v424_v52, %v413_v37  ;;  %v441_v48 = vrot.slane %v435_v34, 4  ;;  %v442_v24 = vrot.slane %v436_v16, 4 }
 0x10d   :  { %v394_v54 = vrot.slane %v387_v0, %v1276_v38  ;;  %v431_v14 = vadd.f32 %v425_v25, %v414_v45  ;;  %v443_v29 = vrot.slane %v437_v53, 4  ;;  %v452_v30 = vmul.f32 %v1337_v56, %v1546_v50 }
 0x10e   :  { %v432_v42 = vadd.f32 %v426_v47, %v415_v20  ;;  %v447_v8 = vadd.f32 %v441_v48, %v430_v7  ;;  %v453_v6 = vmul.f32 %v1337_v56, %v1565_v26  ;;  %v454_v13 = vmul.f32 %v1337_v56, %v1567_v32 }
 0x10f   :  { %v402_v55 = vcombine.low %v394_v54, %v401_v40  ;;  %v448_v49 = vadd.f32 %v442_v24, %v431_v14  ;;  %v458_v43 = vrot.slane %v452_v30, 6  ;;  %v491_v33 = vmul.f32 %v1340_v57, %v1546_v50 }
 0x110   :  { %v449_v15 = vadd.f32 %v443_v29, %v432_v42  ;;  %v459_v21 = vrot.slane %v453_v6, 6  ;;  %v460_v41 = vrot.slane %v454_v13, 6  ;;  %v492_v31 = vmul.f32 %v1340_v57, %v1565_v26 }
 0x111   :  { %405 = vst [vmem:[#allocation11 + $0x6] sm:$0x3f] %v402_v55  ;;  %v464_v36 = vadd.f32 %v458_v43, %v447_v8  ;;  %v493_v63 = vmul.f32 %v1340_v57, %v1567_v32  ;;  %v496_v44 = vadd.f32 %v1353_v60, %v491_v33  ;;  %v501_v56 = vmul.f32 %v1343_v58, %v1546_v50 }
 0x112   :  { %v465_v37 = vadd.f32 %v459_v21, %v448_v49  ;;  %v466_v45 = vadd.f32 %v460_v41, %v449_v15  ;;  %v497_v51 = vadd.f32 %v1353_v60, %v492_v31  ;;  %v502_v19 = vmul.f32 %v1343_v58, %v1565_v26 }
 0x113   :  { %v498_v18 = vadd.f32 %v1353_v60, %v493_v63  ;;  %v503_v20 = vmul.f32 %v1343_v58, %v1567_v32  ;;  %v507_v46 = vrot.slane %v501_v56, 2  ;;  %v518_v57 = vmul.f32 %v1356_v61, %v1546_v50 }
 0x114   :  { %v470_v22 = vcombine.low %v464_v36, %v465_v37  ;;  %v484_v52 = vrot.slane %v466_v45, %v1276_v38  ;;  %v508_v34 = vrot.slane %v502_v19, 2  ;;  %v519_v16 = vmul.f32 %v1356_v61, %v1565_v26 }
 0x115   :  { %v509_v0 = vrot.slane %v503_v20, 2  ;;  %v513_v40 = vadd.f32 %v507_v46, %v496_v44  ;;  %v520_v25 = vmul.f32 %v1356_v61, %v1567_v32  ;;  %v524_v60 = vrot.slane %v518_v57, 4 }
 0x116   :  { %v477_v53 = vrot.slane %v470_v22, %v1276_v38  ;;  %v514_v58 = vadd.f32 %v508_v34, %v497_v51  ;;  %v525_v47 = vrot.slane %v519_v16, 4  ;;  %v535_v7 = vmul.f32 %v1359_v62, %v1546_v50 }
 0x117   :  { %v515_v48 = vadd.f32 %v509_v0, %v498_v18  ;;  %v526_v24 = vrot.slane %v520_v25, 4  ;;  %v530_v54 = vadd.f32 %v524_v60, %v513_v40  ;;  %v536_v14 = vmul.f32 %v1359_v62, %v1565_v26 }
 0x118   :  { %v485_v29 = vcombine.low %v477_v53, %v484_v52  ;;  %v531_v30 = vadd.f32 %v525_v47, %v514_v58  ;;  %v537_v42 = vmul.f32 %v1359_v62, %v1567_v32  ;;  %v541_v61 = vrot.slane %v535_v7, 6  ;;  %v1809_v7 = vld [vmem:[#allocation17_spill] sm:$0xff] }
 0x119   :  { %v532_v8 = vadd.f32 %v526_v24, %v515_v48  ;;  %v542_v6 = vrot.slane %v536_v14, 6  ;;  %v574_v13 = vmul.f32 %v1368_v1, %v1546_v50  ;;  %v575_v55 = vmul.f32 %v1368_v1, %v1565_v26 }
 0x11a   :  { %488 = vst [vmem:[#allocation11 + $0xc] sm:$0x3f] %v485_v29  ;;  %v543_v49 = vrot.slane %v537_v42, 6  ;;  %v547_v43 = vadd.f32 %v541_v61, %v530_v54  ;;  %v576_v33 = vmul.f32 %v1368_v1, %v1567_v32  ;;  %v584_v15 = vmul.f32 %v1371_v2, %v1546_v50  ;;  %v1810_v29 = vld [vmem:[#allocation18_spill] sm:$0xff] }
 0x11b   :  { %v548_v21 = vadd.f32 %v542_v6, %v531_v30  ;;  %v579_v62 = vadd.f32 %v1383_v9, %v574_v13  ;;  %v580_v41 = vadd.f32 %v1383_v9, %v575_v55  ;;  %v585_v31 = vmul.f32 %v1371_v2, %v1565_v26 }
 0x11c   :  { %v549_v36 = vadd.f32 %v543_v49, %v532_v8  ;;  %v581_v63 = vadd.f32 %v1383_v9, %v576_v33  ;;  %v586_v44 = vmul.f32 %v1371_v2, %v1567_v32  ;;  %v590_v56 = vrot.slane %v584_v15, 2 }
 0x11d   :  { %v553_v37 = vcombine.low %v547_v43, %v548_v21  ;;  %v591_v1 = vrot.slane %v585_v31, 2  ;;  %v601_v45 = vmul.f32 %v1374_v4, %v1546_v50  ;;  %v602_v51 = vmul.f32 %v1374_v4, %v1565_v26 }
 0x11e   :  { %v567_v19 = vrot.slane %v549_v36, %v1276_v38  ;;  %v592_v18 = vrot.slane %v586_v44, 2  ;;  %v596_v20 = vadd.f32 %v590_v56, %v579_v62  ;;  %v603_v46 = vmul.f32 %v1374_v4, %v1567_v32  ;;  %v1812_v62 = vld [vmem:[#allocation20_spill] sm:$0xff] }
 0x11f   :  { %v560_v9 = vrot.slane %v553_v37, %v1276_v38  ;;  %v597_v57 = vadd.f32 %v591_v1, %v580_v41  ;;  %v607_v2 = vrot.slane %v601_v45, 4  ;;  %v608_v22 = vrot.slane %v602_v51, 4 }
 0x120   :  { %v598_v52 = vadd.f32 %v592_v18, %v581_v63  ;;  %v609_v34 = vrot.slane %v603_v46, 4  ;;  %v618_v16 = vmul.f32 %v1386_v10, %v1546_v50  ;;  %v619_v0 = vmul.f32 %v1386_v10, %v1565_v26 }
 0x121   :  { %v568_v40 = vcombine.low %v560_v9, %v567_v19  ;;  %v613_v25 = vadd.f32 %v607_v2, %v596_v20  ;;  %v614_v60 = vadd.f32 %v608_v22, %v597_v57  ;;  %v620_v53 = vmul.f32 %v1386_v10, %v1567_v32  ;;  %v1811_v10 = vld [vmem:[#allocation19_spill] sm:$0xff] }
 0x122   :  { %v615_v4 = vadd.f32 %v609_v34, %v598_v52  ;;  %v624_v58 = vrot.slane %v618_v16, 6  ;;  %v625_v47 = vrot.slane %v619_v0, 6  ;;  %v657_v48 = vmul.f32 %v1809_v7, %v1546_v50 }
 0x123   :  { %571 = vst [vmem:[#allocation11 + $0x12] sm:$0x3f] %v568_v40  ;;  %v626_v24 = vrot.slane %v620_v53, 6  ;;  %v658_v54 = vmul.f32 %v1809_v7, %v1565_v26  ;;  %v659_v14 = vmul.f32 %v1809_v7, %v1567_v32  ;;  %v667_v30 = vmul.f32 %v1810_v29, %v1546_v50 }
 0x124   :  { %v630_v42 = vadd.f32 %v624_v58, %v613_v25  ;;  %v631_v61 = vadd.f32 %v625_v47, %v614_v60  ;;  %v662_v8 = vadd.f32 %v1811_v10, %v657_v48  ;;  %v668_v6 = vmul.f32 %v1810_v29, %v1565_v26 }
 0x125   :  { %v632_v13 = vadd.f32 %v626_v24, %v615_v4  ;;  %v663_v55 = vadd.f32 %v1811_v10, %v658_v54  ;;  %v664_v49 = vadd.f32 %v1811_v10, %v659_v14  ;;  %v669_v43 = vmul.f32 %v1810_v29, %v1567_v32 }
 0x126   :  { %v636_v33 = vcombine.low %v630_v42, %v631_v61  ;;  %v673_v15 = vrot.slane %v667_v30, 2  ;;  %v674_v21 = vrot.slane %v668_v6, 2  ;;  %v684_v41 = vmul.f32 %v1812_v62, %v1546_v50 }
 0x127   :  { %v650_v31 = vrot.slane %v632_v13, %v1276_v38  ;;  %v675_v36 = vrot.slane %v669_v43, 2  ;;  %v685_v63 = vmul.f32 %v1812_v62, %v1565_v26  ;;  %v686_v44 = vmul.f32 %v1812_v62, %v1567_v32 }
 0x128   :  { %v643_v56 = vrot.slane %v636_v33, %v1276_v38  ;;  %v679_v37 = vadd.f32 %v673_v15, %v662_v8  ;;  %v680_v1 = vadd.f32 %v674_v21, %v663_v55  ;;  %v690_v45 = vrot.slane %v684_v41, 4 }
 0x129   :  { %v681_v51 = vadd.f32 %v675_v36, %v664_v49  ;;  %v691_v19 = vrot.slane %v685_v63, 4  ;;  %v692_v18 = vrot.slane %v686_v44, 4  ;;  %v701_v20 = vmul.f32 %v1442_v17, %v1546_v50 }
 0x12a   :  { %v651_v46 = vcombine.low %v643_v56, %v650_v31  ;;  %v696_v9 = vadd.f32 %v690_v45, %v679_v37  ;;  %v702_v57 = vmul.f32 %v1442_v17, %v1565_v26  ;;  %v703_v2 = vmul.f32 %v1442_v17, %v1567_v32 }
 0x12b   :  { %v697_v22 = vadd.f32 %v691_v19, %v680_v1  ;;  %v698_v52 = vadd.f32 %v692_v18, %v681_v51  ;;  %v707_v34 = vrot.slane %v701_v20, 6  ;;  %v740_v16 = vmul.f32 %v1491_v59, %v1546_v50 }
 0x12c   :  { %654 = vst [vmem:[#allocation11 + $0x18] sm:$0x3f] %v651_v46  ;;  %v708_v0 = vrot.slane %v702_v57, 6  ;;  %v709_v40 = vrot.slane %v703_v2, 6  ;;  %v741_v25 = vmul.f32 %v1491_v59, %v1565_v26  ;;  %v742_v60 = vmul.f32 %v1491_v59, %v1567_v32 }
 0x12d   :  { %v713_v53 = vadd.f32 %v707_v34, %v696_v9  ;;  %v745_v4 = vadd.f32 %v1521_v27, %v740_v16  ;;  %v750_v17 = vmul.f32 %v1511_v12, %v1546_v50  ;;  %v751_v58 = vmul.f32 %v1511_v12, %v1565_v26 }
 0x12e   :  { %v714_v47 = vadd.f32 %v708_v0, %v697_v22  ;;  %v715_v7 = vadd.f32 %v709_v40, %v698_v52  ;;  %v746_v48 = vadd.f32 %v1521_v27, %v741_v25  ;;  %v747_v24 = vadd.f32 %v1521_v27, %v742_v60 }
 0x12f   :  { %v752_v54 = vmul.f32 %v1511_v12, %v1567_v32  ;;  %v756_v14 = vrot.slane %v750_v17, 2  ;;  %v757_v59 = vrot.slane %v751_v58, 2  ;;  %v767_v29 = vmul.f32 %v1524_v3, %v1546_v50 }
 0x130   :  { %v719_v30 = vcombine.low %v713_v53, %v714_v47  ;;  %v733_v42 = vrot.slane %v715_v7, %v1276_v38  ;;  %v768_v61 = vmul.f32 %v1524_v3, %v1565_v26  ;;  %v769_v10 = vmul.f32 %v1524_v3, %v1567_v32 }
 0x131   :  { %v758_v8 = vrot.slane %v752_v54, 2  ;;  %v762_v6 = vadd.f32 %v756_v14, %v745_v4  ;;  %v763_v27 = vadd.f32 %v757_v59, %v746_v48  ;;  %v773_v13 = vrot.slane %v767_v29, 4 }
 0x132   :  { %v726_v12 = vrot.slane %v719_v30, %v1276_v38  ;;  %v774_v55 = vrot.slane %v768_v61, 4  ;;  %v775_v49 = vrot.slane %v769_v10, 4  ;;  %v784_v43 = vmul.f32 %v1527_v35, %v1546_v50 }
 0x133   :  { %v764_v33 = vadd.f32 %v758_v8, %v747_v24  ;;  %v779_v15 = vadd.f32 %v773_v13, %v762_v6  ;;  %v785_v21 = vmul.f32 %v1527_v35, %v1565_v26  ;;  %v786_v62 = vmul.f32 %v1527_v35, %v1567_v32 }
 0x134   :  { %v734_v3 = vcombine.low %v726_v12, %v733_v42  ;;  %v780_v41 = vadd.f32 %v774_v55, %v763_v27  ;;  %v790_v31 = vrot.slane %v784_v43, 6  ;;  %v823_v36 = vmul.f32 %v1535_v11, %v1546_v50 }
 0x135   :  { %v781_v63 = vadd.f32 %v775_v49, %v764_v33  ;;  %v791_v44 = vrot.slane %v785_v21, 6  ;;  %v792_v56 = vrot.slane %v786_v62, 6  ;;  %v824_v37 = vmul.f32 %v1535_v11, %v1565_v26 }
 0x136   :  { %737 = vst [vmem:[#allocation11 + $0x1e] sm:$0x3f] %v734_v3  ;;  %v796_v1 = vadd.f32 %v790_v31, %v779_v15  ;;  %v825_v45 = vmul.f32 %v1535_v11, %v1567_v32  ;;  %v828_v51 = vadd.f32 %v1541_v28, %v823_v36  ;;  %v833_v35 = vmul.f32 %v1538_v5, %v1546_v50 }
 0x137   :  { %v797_v19 = vadd.f32 %v791_v44, %v780_v41  ;;  %v798_v18 = vadd.f32 %v792_v56, %v781_v63  ;;  %v829_v20 = vadd.f32 %v1541_v28, %v824_v37  ;;  %v834_v46 = vmul.f32 %v1538_v5, %v1565_v26 }
 0x138   :  { %v830_v9 = vadd.f32 %v1541_v28, %v825_v45  ;;  %v835_v57 = vmul.f32 %v1538_v5, %v1567_v32  ;;  %v839_v2 = vrot.slane %v833_v35, 2  ;;  %v850_v11 = vmul.f32 %v1544_v39, %v1546_v50 }
 0x139   :  { %v802_v22 = vcombine.low %v796_v1, %v797_v19  ;;  %v816_v52 = vrot.slane %v798_v18, %v1276_v38  ;;  %v840_v34 = vrot.slane %v834_v46, 2  ;;  %v851_v16 = vmul.f32 %v1544_v39, %v1565_v26 }
 0x13a   :  { %v841_v0 = vrot.slane %v835_v57, 2  ;;  %v845_v40 = vadd.f32 %v839_v2, %v828_v51  ;;  %v852_v25 = vmul.f32 %v1544_v39, %v1567_v32  ;;  %v856_v28 = vrot.slane %v850_v11, 4 }
 0x13b   :  { %v809_v60 = vrot.slane %v802_v22, %v1276_v38  ;;  %v846_v5 = vadd.f32 %v840_v34, %v829_v20  ;;  %v857_v53 = vrot.slane %v851_v16, 4  ;;  %v867_v4 = vmul.f32 %v1553_v23, %v1546_v50 }
 0x13c   :  { %v847_v17 = vadd.f32 %v841_v0, %v830_v9  ;;  %v858_v58 = vrot.slane %v852_v25, 4  ;;  %v862_v47 = vadd.f32 %v856_v28, %v845_v40  ;;  %v868_v7 = vmul.f32 %v1553_v23, %v1565_v26 }
 0x13d   :  { %v817_v48 = vcombine.low %v809_v60, %v816_v52  ;;  %v863_v24 = vadd.f32 %v857_v53, %v846_v5  ;;  %v869_v54 = vmul.f32 %v1553_v23, %v1567_v32  ;;  %v873_v14 = vrot.slane %v867_v4, 6 }
 0x13e   :  { %v864_v39 = vadd.f32 %v858_v58, %v847_v17  ;;  %v874_v59 = vrot.slane %v868_v7, 6 }
 0x13f   :  { %820 = vst [vmem:[#allocation11 + $0x24] sm:$0x3f] %v817_v48  ;;  %v875_v29 = vrot.slane %v869_v54, 6  ;;  %v879_v30 = vadd.f32 %v873_v14, %v862_v47 }
 0x140   :  { %v880_v42 = vadd.f32 %v874_v59, %v863_v24 }
 0x141   :  { %v881_v61 = vadd.f32 %v875_v29, %v864_v39 }
 0x142   :  { %v885_v50 = vcombine.low %v879_v30, %v880_v42 }
 0x143   :  { %v899_v26 = vrot.slane %v881_v61, %v1276_v38 }
 0x144   :  { %v892_v10 = vrot.slane %v885_v50, %v1276_v38 }
 0x146   :  { %v900_v8 = vcombine.low %v892_v10, %v899_v26 }
 0x148   :  { %903 = vst [vmem:[#allocation11 + $0x2a] sm:$0x3f] %v900_v8 }
 0x149   :  { %1072 = shalt.err (!%p1069_p10)
}
 0x14a   :  { %s1114_s26 = smov 96   ;;  %s1115_s27 = smov 6  }
 0x14b   :  { %915 = dma.vmem_to_hbm [thread:$0]  %s910_s24, 768, %s1800_s4, [#allocation4], %s1114_s26, %s1114_s26, %s1115_s27  }
 0x14c   :  { %1089 = dma.done.wait [#allocation4], 768  }
 0x14d   :  { %1090 = vsyncadd [#allocation4], 4294966528 }
 0x14e   :  { %919 = vsyncpa [#allocation3], 1 }
 0x14f   :  { %920 = vsyncpa [#allocation7], 1 }
 0x150   :  { %921 = vsyncpa [#allocation4], 1 }
 0x151   :  { %922 = vsyncpa [#allocation5], 1 }
 0x152   :  { %923 = vsyncpa [#allocation10], 1 }

</bundles_post_ra>
